<compile_context>
chip_gen: v5e
topology: v5e:2x2
jax: 0.10.0
libtpu: 0.0.40
codegen_flags: <defaults>
</compile_context>

<pallas_src>
import jax
import jax.numpy as jnp
from jax import lax
from jax.experimental import pallas as pl
from jax.experimental.pallas import tpu as pltpu


def _pool_linear_kernel(x_ref, w_ref, o_ref):
    # x_ref: (b_tile, k_chunk)  lane-dense feature slab (flattened C*HW chunk)
    # w_ref: (1, k_chunk)       per-channel weight / HW, replicated over HW
    # o_ref: (b_tile, 1)        f32 accumulator / output, resident across k
    @pl.when(pl.program_id(1) == 0)
    def _():
        o_ref[...] = jnp.zeros_like(o_ref)

    # Weighted reduction on the (otherwise idle) MXU with f32 accumulation.
    # Avoids materializing an f32 copy of the (large) feature block in VMEM.
    o_ref[...] += lax.dot_general(
        x_ref[...], w_ref[...],
        dimension_numbers=(((1,), (1,)), ((), ())),
        preferred_element_type=jnp.float32)


def _round_up(x, m):
    return ((x + m - 1) // m) * m


def _choose_tiling(n, k, itemsize, target_block_bytes):
    """Pick (b_tile, k_chunk) from the true lane-dense block footprint."""
    bytes_per_row = k * itemsize

    if n <= 8:
        # Block dim == full array dim is always legal (no 8-alignment needed).
        b_tile = n
    else:
        rows_fit = max(1, target_block_bytes // bytes_per_row)
        b_tile = max(8, (min(n, rows_fit) // 8) * 8)
        # v7x has 2 TensorCores sharing HBM: keep >= 2 blocks on the
        # 'parallel' batch axis whenever the batch allows it.
        b_tile = min(b_tile, _round_up(-(-n // 2), 8))
        b_tile = max(8, b_tile)

    # Reduction-axis chunk: multiple of 128, sized so one block fits budget,
    # and exactly dividing k (so no masking is needed on the reduction axis).
    cols_budget = max(128, (target_block_bytes // (b_tile * itemsize)) // 128 * 128)
    if cols_budget >= k:
        return b_tile, k
    c = cols_budget
    while c >= 128:
        if k % c == 0:
            return b_tile, c
        c -= 128
    return b_tile, k  # fallback: single full-width block (always legal)


def mydesnet_head(feat_nchw, w_linear, *, target_block_bytes=8 << 20):
    """feat_nchw: (N, C, H, W) backbone features (f32 or bf16);
    w_linear: (1, C) torch Linear weight (no bias).
    Returns (N, 1) f32 = Linear(AdaptiveAvgPool2d(feat).view(N, -1))."""
    N, C, H, W = feat_nchw.shape
    HW = H * W
    K = C * HW
    itemsize = feat_nchw.dtype.itemsize

    # Free reshape (NCHW is contiguous): lane-dense (N, C*HW).  No transpose,
    # no padding, no extra HBM copy of the feature map.
    x = feat_nchw.reshape(N, K)

    # Per-channel weight with the 1/HW mean folded in (computed in f32),
    # replicated across HW so it lines up with flattened index c*HW + s.
    # Cast to the feature dtype so the in-kernel dot does not promote the
    # feature block; accumulation stays f32 via preferred_element_type.
    w_rep = jnp.broadcast_to(
        w_linear.reshape(C, 1).astype(jnp.float32) / HW, (C, HW)
    ).reshape(1, K).astype(feat_nchw.dtype)

    b_tile, k_chunk = _choose_tiling(N, K, itemsize, target_block_bytes)
    n_b = pl.cdiv(N, b_tile)
    n_k = K // k_chunk  # k_chunk divides K by construction

    # Explicit VMEM budget from the *actual* (padded) block footprint:
    # double-buffered input + weight blocks plus the tiny output block.
    block_in = b_tile * k_chunk * itemsize
    block_w = 8 * k_chunk * itemsize            # sublane 1 -> 8 padding
    block_out = max(b_tile, 8) * 128 * 4        # lane 1 -> 128 padding
    vmem_limit = min(2 * (block_in + block_w + block_out) + (2 << 20), 48 << 20)

    out = pl.pallas_call(
        _pool_linear_kernel,
        out_shape=jax.ShapeDtypeStruct((N, 1), jnp.float32),
        grid_spec=pltpu.PrefetchScalarGridSpec(
            num_scalar_prefetch=0,
            grid=(n_b, n_k),
            in_specs=[
                pl.BlockSpec((b_tile, k_chunk), lambda i, k: (i, k)),
                pl.BlockSpec((1, k_chunk), lambda i, k: (0, k)),
            ],
            out_specs=pl.BlockSpec((b_tile, 1), lambda i, k: (i, 0)),
        ),
        compiler_params=pltpu.CompilerParams(
            dimension_semantics=("parallel", "arbitrary"),
            vmem_limit_bytes=int(vmem_limit)),
    )(x, w_rep)
    return out


def reference_head(feat_nchw, w_linear):
    pooled = jnp.mean(feat_nchw.astype(jnp.float32), axis=(2, 3))   # (N, C)
    return pooled @ jnp.transpose(w_linear.astype(jnp.float32))     # (N, 1)


if __name__ == "__main__":
    key = jax.random.PRNGKey(0)
    k_feat, k_w, k_feat2 = jax.random.split(key, 3)

    C = 1024  # fixed by the module's Linear(1024, 1, bias=False)
    bound = 1.0 / (C ** 0.5)
    w_linear = jax.random.uniform(k_w, (1, C), dtype=jnp.float32,
                                  minval=-bound, maxval=bound)

    # Case 1: tiny batch, single block (default tiling), f32 features.
    N, H, W = 2, 4, 4
    feat = jax.random.normal(k_feat, (N, C, H, W), dtype=jnp.float32)
    out = jax.block_until_ready(mydesnet_head(feat, w_linear))
    ref = reference_head(feat, w_linear)
    assert out.shape == (N, 1)
    assert jnp.allclose(out, ref, atol=1e-4, rtol=1e-4), (out, ref)

    # Case 2: ragged batch (N % b_tile != 0), chunked reduction with the
    # resident-output accumulator, bf16 feature streaming (f32 accumulation).
    N2 = 10
    feat2 = jax.random.normal(k_feat2, (N2, C, H, W), dtype=jnp.float32)
    feat2_bf16 = feat2.astype(jnp.bfloat16)
    out2 = jax.block_until_ready(
        mydesnet_head(feat2_bf16, w_linear, target_block_bytes=128 << 10))
    ref2 = reference_head(feat2_bf16, w_linear)
    assert out2.shape == (N2, 1)
    assert jnp.allclose(out2, ref2, atol=1e-2, rtol=1e-2), (out2, ref2)

    print("KERNEL_OK")
</pallas_src>

<mosaic_0001>
module attributes {stable_mosaic.version = 11 : i64} {
  func.func @_pool_linear_kernel(%arg0: i32, %arg1: i32, %arg2: memref<2x16384xf32, #tpu.memory_space<vmem>>, %arg3: memref<1x16384xf32, #tpu.memory_space<vmem>>, %arg4: memref<2x1xf32, #tpu.memory_space<vmem>>) attributes {dimension_semantics = [#tpu.dimension_semantics<parallel>, #tpu.dimension_semantics<arbitrary>], iteration_bounds = array<i64: 1, 1>, scalar_prefetch = 0 : i64, scratch_operands = 0 : i64, tpu.core_type = #tpu.core_type<tc>, window_params = [{transform_indices = @transform_0, window_bounds = array<i64: 2, 16384>}, {transform_indices = @transform_1, window_bounds = array<i64: 1, 16384>}, {transform_indices = @transform_2, window_bounds = array<i64: 2, 1>}]} {
    %c0_i32 = arith.constant 0 : i32
    %0 = arith.cmpi eq, %arg1, %c0_i32 : i32
    %1 = arith.extui %0 : i1 to i32
    %c0_i32_0 = arith.constant 0 : i32
    %2 = arith.cmpi ne, %1, %c0_i32_0 : i32
    scf.if %2 {
      %cst_8 = arith.constant 0.000000e+00 : f32
      %9 = vector.broadcast %cst_8 : f32 to vector<2x1xf32>
      %c0_9 = arith.constant 0 : index
      %c0_10 = arith.constant 0 : index
      %10 = vector.load %arg4[%c0_9, %c0_10] : memref<2x1xf32, #tpu.memory_space<vmem>>, vector<2x1xf32>
      tpu.vector_store %arg4[%c0_9, %c0_10], %9 {strides = array<i32>} : memref<2x1xf32, #tpu.memory_space<vmem>>, vector<2x1xf32>,
    } else {
    }
    %c0 = arith.constant 0 : index
    %c0_1 = arith.constant 0 : index
    %3 = vector.load %arg4[%c0, %c0_1] : memref<2x1xf32, #tpu.memory_space<vmem>>, vector<2x1xf32>
    %c0_2 = arith.constant 0 : index
    %c0_3 = arith.constant 0 : index
    %4 = vector.load %arg2[%c0_2, %c0_3] : memref<2x16384xf32, #tpu.memory_space<vmem>>, vector<2x16384xf32>
    %c0_4 = arith.constant 0 : index
    %c0_5 = arith.constant 0 : index
    %5 = vector.load %arg3[%c0_4, %c0_5] : memref<1x16384xf32, #tpu.memory_space<vmem>>, vector<1x16384xf32>
    %cst = arith.constant dense<0.000000e+00> : vector<2x1xf32>
    %6 = tpu.matmul %4, %5, %cst {dimension_numbers = #tpu.dot_dimension_numbers<[1], [1], [0], [0], [0, 0, 1, 0], [], []>} : vector<2x16384xf32>, vector<1x16384xf32>, vector<2x1xf32> -> vector<2x1xf32>
    %7 = arith.addf %3, %6 : vector<2x1xf32>
    %c0_6 = arith.constant 0 : index
    %c0_7 = arith.constant 0 : index
    %8 = vector.load %arg4[%c0_6, %c0_7] : memref<2x1xf32, #tpu.memory_space<vmem>>, vector<2x1xf32>
    tpu.vector_store %arg4[%c0_6, %c0_7], %7 {strides = array<i32>} : memref<2x1xf32, #tpu.memory_space<vmem>>, vector<2x1xf32>,
    return
  }
  func.func @transform_0(%arg0: i32, %arg1: i32) -> (i32, i32) {
    %c0_i32 = arith.constant 0 : i32
    return %arg0, %arg1 : i32, i32
  }
  func.func @transform_1(%arg0: i32, %arg1: i32) -> (i32, i32) {
    %c0_i32 = arith.constant 0 : i32
    %c0_i32_0 = arith.constant 0 : i32
    return %c0_i32, %arg1 : i32, i32
  }
  func.func @transform_2(%arg0: i32, %arg1: i32) -> (i32, i32) {
    %c0_i32 = arith.constant 0 : i32
    %c0_i32_0 = arith.constant 0 : i32
    return %arg0, %c0_i32 : i32, i32
  }
}

</mosaic_0001>

<bundles_post_ra>
// kernel: tpu_custom_call.1
= control target key start
LH: loop header
LB: loop body
LE: loop exit
PB: predicated region body
PF: predicated region fallthrough
CT: control target
= control target key end

     0   :  { %7 = vsyncpa [#allocation3], 0  ;;  %s2278_s0 = inlined_call_operand.hbm [shape: f32[2,16384], index: 0, kind: input, shape index: {}]   ;;  %s2279_s1 = inlined_call_operand.hbm [shape: f32[1,16384], index: 1, kind: input, shape index: {}]   ;;  %s2280_s2 = inlined_call_operand.vmem [shape: f32[2,1], index: 2, kind: output, shape index: {}]  }
   0x1   :  { %s14_s11 = sshll.u32 %s2278_s0, 4  ;;  %s15_s11 = int_to_ptr.hbm [resolvable:$true] %s14_s11 }
   0x2   :  { %8 = vsyncpa [#allocation5], 0  ;;  %s1139_s12 = smov [#allocation2]   ;;  %s25_s16 = sshll.u32 %s2279_s1, 4  ;;  %s26_s16 = int_to_ptr.hbm [resolvable:$true] %s25_s16 }
   0x3   :  { %s16_s13 = sshll.u32 %s1139_s12, 4  ;;  %s1140_s17 = smov [#allocation4]   ;;  %s17_s13 = int_to_ptr.vmem [resolvable:$true] %s16_s13 }
   0x4   :  { %19 = dma.hbm_to_vmem [thread:$0]  %s15_s11, 4096, %s17_s13, [#allocation3]  }
   0x5   :  { %s27_s18 = sshll.u32 %s1140_s17, 4  ;;  %s28_s18 = int_to_ptr.vmem [resolvable:$true] %s27_s18 }
   0x6   :  { %30 = dma.hbm_to_vmem [thread:$0]  %s26_s16, 2048, %s28_s18, [#allocation5]  }
   0x7   :  { %1135 = dma.done.wait [#allocation3], 4096  }
   0x8   :  { %1136 = vsyncadd [#allocation3], 4294963200 }
   0x9   :  { %1137 = dma.done.wait [#allocation5], 2048  }
   0xa   :  { %1138 = vsyncadd [#allocation5], 4294965248  ;;  %vm43_vm0 = vcmask 1024   ;;  %v1141_v0 = vmov 0.0   ;;  %v1167_v1 = vld [vmem:[#allocation4] sm:$0xff]  ;;  %v1169_v2 = vld [vmem:[#allocation4 + $0x8] sm:$0xff] }
   0xb   :  { %44 = vst.msk [vmem:[%s2280_s2] sm:$0x3] %vm43_vm0, %v1141_v0  ;;  %v111_v4 = vperm.slane %v1167_v1, 1  ;;  %v112_v5 = vperm.slane %v1167_v1, 2  ;;  %v113_v6 = vperm.slane %v1167_v1, 3  ;;  %v1176_v8 = vld [vmem:[#allocation4 + $0x30] sm:$0xff] }
   0xc   :  { %2283 = vst [vmem:[#allocation8_spill] sm:$0xff] %v1169_v2  ;;  %v115_v9 = vperm.slane %v1167_v1, 5  ;;  %v116_v10 = vperm.slane %v1167_v1, 6  ;;  %v117_v11 = vperm.slane %v1167_v1, 7  ;;  %v119_v13 = vperm.slane %v1169_v2, 1  ;;  %v1186_v17 = vld [vmem:[#allocation4 + $0x38] sm:$0xff] }
   0xd   :  { %v120_v14 = vperm.slane %v1169_v2, 2  ;;  %v121_v15 = vperm.slane %v1169_v2, 3  ;;  %v123_v18 = vperm.slane %v1169_v2, 5  ;;  %v124_v19 = vperm.slane %v1169_v2, 6  ;;  %v1196_v26 = vld [vmem:[#allocation4 + $0x40] sm:$0xff]  ;;  %v1206_v35 = vld [vmem:[#allocation4 + $0x48] sm:$0xff] }
   0xe   :  { %v125_v20 = vperm.slane %v1169_v2, 7  ;;  %v159_v22 = vperm.slane %v1176_v8, 1  ;;  %v160_v23 = vperm.slane %v1176_v8, 2  ;;  %v161_v24 = vperm.slane %v1176_v8, 3  ;;  %v1216_v44 = vld [vmem:[#allocation4 + $0x50] sm:$0xff]  ;;  %v1226_v53 = vld [vmem:[#allocation4 + $0x58] sm:$0xff] }
   0xf   :  { %v163_v27 = vperm.slane %v1176_v8, 5  ;;  %v164_v28 = vperm.slane %v1176_v8, 6  ;;  %v165_v29 = vperm.slane %v1176_v8, 7  ;;  %v167_v31 = vperm.slane %v1186_v17, 1  ;;  %v1236_v62 = vld [vmem:[#allocation4 + $0x60] sm:$0xff]  ;;  %v1246_v39 = vld [vmem:[#allocation4 + $0x68] sm:$0xff] }
  0x10   :  { %v168_v32 = vperm.slane %v1186_v17, 2  ;;  %v169_v33 = vperm.slane %v1186_v17, 3  ;;  %v171_v36 = vperm.slane %v1186_v17, 5  ;;  %v172_v37 = vperm.slane %v1186_v17, 6  ;;  %v1256_v48 = vld [vmem:[#allocation4 + $0x70] sm:$0xff]  ;;  %v1266_v52 = vld [vmem:[#allocation4 + $0x78] sm:$0xff] }
  0x11   :  { %v173_v38 = vperm.slane %v1186_v17, 7  ;;  %v175_v40 = vperm.slane %v1196_v26, 1  ;;  %v176_v41 = vperm.slane %v1196_v26, 2  ;;  %v177_v42 = vperm.slane %v1196_v26, 3 }
  0x12   :  { %v179_v45 = vperm.slane %v1196_v26, 5  ;;  %v180_v46 = vperm.slane %v1196_v26, 6  ;;  %v181_v47 = vperm.slane %v1196_v26, 7  ;;  %v183_v49 = vperm.slane %v1206_v35, 1 }
  0x13   :  { %v184_v50 = vperm.slane %v1206_v35, 2  ;;  %v185_v51 = vperm.slane %v1206_v35, 3  ;;  %v187_v54 = vperm.slane %v1206_v35, 5  ;;  %v188_v55 = vperm.slane %v1206_v35, 6 }
  0x14   :  { %v189_v56 = vperm.slane %v1206_v35, 7  ;;  %v191_v58 = vperm.slane %v1216_v44, 1  ;;  %v192_v59 = vperm.slane %v1216_v44, 2  ;;  %v193_v60 = vperm.slane %v1216_v44, 3 }
  0x15   :  { %v195_v63 = vperm.slane %v1216_v44, 5  ;;  %v196_v0 = vperm.slane %v1216_v44, 6  ;;  %v197_v16 = vperm.slane %v1216_v44, 7  ;;  %v1289_v57 = vrot.slane %v111_v4, 6 }
  0x16   :  { %v1293_v43 = vrot.slane %v112_v5, 4  ;;  %v1297_v34 = vrot.slane %v113_v6, 2  ;;  %v1301_v25 = vrot.slane %v115_v9, 6  ;;  %v1305_v21 = vrot.slane %v116_v10, 4 }
  0x17   :  { %v1309_v4 = vrot.slane %v117_v11, 2  ;;  %v1313_v5 = vrot.slane %v119_v13, 6  ;;  %v1317_v6 = vrot.slane %v120_v14, 4  ;;  %v1321_v9 = vrot.slane %v121_v15, 2 }
  0x18   :  { %v1325_v10 = vrot.slane %v123_v18, 6  ;;  %v1329_v11 = vrot.slane %v124_v19, 4  ;;  %v1333_v13 = vrot.slane %v125_v20, 2  ;;  %v1337_v14 = vrot.slane %v159_v22, 6 }
  0x19   :  { %2284 = vst [vmem:[#allocation9_spill] sm:$0xff] %v1313_v5  ;;  %v1341_v15 = vrot.slane %v160_v23, 4  ;;  %v1345_v18 = vrot.slane %v161_v24, 2  ;;  %v1349_v19 = vrot.slane %v163_v27, 6  ;;  %v1353_v20 = vrot.slane %v164_v28, 4 }
  0x1a   :  { %2285 = vst [vmem:[#allocation10_spill] sm:$0xff] %v1317_v6  ;;  %v1357_v22 = vrot.slane %v165_v29, 2  ;;  %v1361_v23 = vrot.slane %v167_v31, 6  ;;  %v1365_v24 = vrot.slane %v168_v32, 4  ;;  %v1369_v27 = vrot.slane %v169_v33, 2 }
  0x1b   :  { %2286 = vst [vmem:[#allocation11_spill] sm:$0xff] %v1321_v9  ;;  %v1373_v28 = vrot.slane %v171_v36, 6  ;;  %v1377_v29 = vrot.slane %v172_v37, 4  ;;  %v1381_v31 = vrot.slane %v173_v38, 2  ;;  %v1385_v32 = vrot.slane %v175_v40, 6 }
  0x1c   :  { %2287 = vst [vmem:[#allocation12_spill] sm:$0xff] %v1325_v10  ;;  %v1389_v33 = vrot.slane %v176_v41, 4  ;;  %v1393_v36 = vrot.slane %v177_v42, 2  ;;  %v1397_v37 = vrot.slane %v179_v45, 6  ;;  %v1401_v38 = vrot.slane %v180_v46, 4 }
  0x1d   :  { %2288 = vst [vmem:[#allocation13_spill] sm:$0xff] %v1329_v11  ;;  %v1405_v40 = vrot.slane %v181_v47, 2  ;;  %v1409_v41 = vrot.slane %v183_v49, 6  ;;  %v1413_v42 = vrot.slane %v184_v50, 4  ;;  %v1417_v45 = vrot.slane %v185_v51, 2 }
  0x1e   :  { %2289 = vst [vmem:[#allocation14_spill] sm:$0xff] %v1333_v13  ;;  %v1421_v46 = vrot.slane %v187_v54, 6  ;;  %v1425_v47 = vrot.slane %v188_v55, 4  ;;  %v1429_v49 = vrot.slane %v189_v56, 2  ;;  %v1433_v50 = vrot.slane %v191_v58, 6 }
  0x1f   :  { %v1437_v51 = vrot.slane %v192_v59, 4  ;;  %v1441_v54 = vrot.slane %v193_v60, 2  ;;  %v1445_v55 = vrot.slane %v195_v63, 6  ;;  %v1449_v56 = vrot.slane %v196_v0, 4 }
  0x20   :  { %v1453_v58 = vrot.slane %v197_v16, 2  ;;  %v2290_v7 = vperm.slane %v1226_v53, 1  ;;  %v2291_v12 = vperm.slane %v1226_v53, 2  ;;  %v2292_v30 = vperm.slane %v1226_v53, 3 }
  0x21   :  { %v2293_v61 = vperm.slane %v1226_v53, 5  ;;  %v2294_v3 = vperm.slane %v1226_v53, 6  ;;  %v2295_v11 = vperm.slane %v1226_v53, 7  ;;  %v2296_v13 = vperm.slane %v1236_v62, 1 }
  0x22   :  { %v1457_v59 = vrot.slane %v2290_v7, 6  ;;  %v1461_v60 = vrot.slane %v2291_v12, 4  ;;  %v1465_v63 = vrot.slane %v2292_v30, 2  ;;  %v2298_v10 = vperm.slane %v1236_v62, 2 }
  0x23   :  { %v1469_v0 = vrot.slane %v2293_v61, 6  ;;  %v1473_v16 = vrot.slane %v2294_v3, 4  ;;  %v1477_v7 = vrot.slane %v2295_v11, 2  ;;  %v1481_v12 = vrot.slane %v2296_v13, 6 }
  0x24   :  { %v1485_v30 = vrot.slane %v2298_v10, 4  ;;  %v2300_v6 = vperm.slane %v1236_v62, 3  ;;  %v2302_v9 = vperm.slane %v1236_v62, 5  ;;  %v2304_v2 = vperm.slane %v1236_v62, 6 }
  0x25   :  { %2297 = vst [vmem:[#allocation15_spill] sm:$0xff] %v1481_v12  ;;  %v2306_v5 = vperm.slane %v1236_v62, 7  ;;  %v2308_v12 = vperm.slane %v1246_v39, 1  ;;  %vm334_vm1 = vcmask 1041408   ;;  %vm336_vm2 = vcmask 1045508  }
  0x26   :  { %2299 = vst [vmem:[#allocation16_spill] sm:$0xff] %v1485_v30  ;;  %v1489_v61 = vrot.slane %v2300_v6, 2  ;;  %v1493_v3 = vrot.slane %v2302_v9, 6  ;;  %v1497_v11 = vrot.slane %v2304_v2, 4  ;;  %v2310_v6 = vperm.slane %v1246_v39, 2 }
  0x27   :  { %v1501_v13 = vrot.slane %v2306_v5, 2  ;;  %v1505_v10 = vrot.slane %v2308_v12, 6  ;;  %v2312_v9 = vperm.slane %v1246_v39, 3  ;;  %v2314_v2 = vperm.slane %v1246_v39, 5 }
  0x28   :  { %2301 = vst [vmem:[#allocation17_spill] sm:$0xff] %v1489_v61  ;;  %v1509_v30 = vrot.slane %v2310_v6, 4  ;;  %v2316_v5 = vperm.slane %v1246_v39, 6  ;;  %v2318_v12 = vperm.slane %v1246_v39, 7  ;;  %v2319_v61 = vperm.slane %v1256_v48, 1 }
  0x29   :  { %2303 = vst [vmem:[#allocation18_spill] sm:$0xff] %v1493_v3  ;;  %v1513_v3 = vrot.slane %v2312_v9, 2  ;;  %vm338_vm3 = vcmask 1043456  }
  0x2a   :  { %2305 = vst [vmem:[#allocation19_spill] sm:$0xff] %v1497_v11  ;;  %v1517_v11 = vrot.slane %v2314_v2, 6  ;;  %v1529_v6 = vrot.slane %v2319_v61, 6  ;;  %v337_v61 = vsel %vm336_vm2, %v1293_v43, %v1297_v34  ;;  %v2332_v34 = vperm.slane %v1266_v52, 1 }
  0x2b   :  { %2307 = vst [vmem:[#allocation20_spill] sm:$0xff] %v1501_v13  ;;  %v1521_v13 = vrot.slane %v2316_v5, 4 }
  0x2c   :  { %2309 = vst [vmem:[#allocation21_spill] sm:$0xff] %v1505_v10  ;;  %v1525_v10 = vrot.slane %v2318_v12, 2  ;;  %v2326_v12 = vperm.slane %v1167_v1, 0  ;;  %v1567_v43 = vrot.slane %v2332_v34, 6 }
  0x2d   :  { %2311 = vst [vmem:[#allocation22_spill] sm:$0xff] %v1509_v30  ;;  %v2320_v30 = vperm.slane %v1256_v48, 2 }
  0x2e   :  { %2313 = vst [vmem:[#allocation23_spill] sm:$0xff] %v1513_v3  ;;  %v2322_v3 = vperm.slane %v1256_v48, 3 }
  0x2f   :  { %2315 = vst [vmem:[#allocation24_spill] sm:$0xff] %v1517_v11  ;;  %v1533_v9 = vrot.slane %v2320_v30, 4  ;;  %v2324_v11 = vperm.slane %v1256_v48, 5  ;;  %v2327_v30 = vperm.slane %v1256_v48, 6 }
  0x30   :  { %2317 = vst [vmem:[#allocation25_spill] sm:$0xff] %v1521_v13  ;;  %v1537_v2 = vrot.slane %v2322_v3, 2  ;;  %v335_v13 = vsel %vm334_vm1, %v2326_v12, %v1289_v57  ;;  %v2329_v3 = vperm.slane %v1256_v48, 7  ;;  %v341_v57 = vsel %vm336_vm2, %v1305_v21, %v1309_v4 }
  0x31   :  { %2321 = vst [vmem:[#allocation26_spill] sm:$0xff] %v1533_v9  ;;  %v1541_v5 = vrot.slane %v2324_v11, 6  ;;  %v1552_v9 = vrot.slane %v2327_v30, 4  ;;  %v2331_v11 = vperm.slane %v1167_v1, 4  ;;  %v2333_v12 = vperm.slane %v1266_v52, 2 }
  0x32   :  { %2323 = vst [vmem:[#allocation27_spill] sm:$0xff] %v1537_v2  ;;  %v1556_v2 = vrot.slane %v2329_v3, 2  ;;  %v2335_v3 = vperm.slane %v1266_v52, 3  ;;  %v2336_v1 = vperm.slane %v1266_v52, 5  ;;  %v2338_v21 = vperm.slane %v1266_v52, 7 }
  0x33   :  { %2325 = vst [vmem:[#allocation28_spill] sm:$0xff] %v1541_v5  ;;  %v340_v5 = vsel %vm334_vm1, %v2331_v11, %v1301_v25  ;;  %v1571_v30 = vrot.slane %v2333_v12, 4  ;;  %v2337_v25 = vperm.slane %v1266_v52, 6  ;;  %v1590_v34 = vsel %vm338_vm3, %v335_v13, %v337_v61 }
  0x34   :  { %2328 = vst [vmem:[#allocation29_spill] sm:$0xff] %v1552_v9  ;;  %v1575_v9 = vrot.slane %v2335_v3, 2  ;;  %v1587_v4 = vrot.slane %v2338_v21, 2  ;;  %v2339_v12 = vperm.slane %v1176_v8, 0  ;;  %v377_v13 = vsel %vm336_vm2, %v1353_v20, %v1357_v22 }
  0x35   :  { %2330 = vst [vmem:[#allocation30_spill] sm:$0xff] %v1556_v2  ;;  %v1579_v2 = vrot.slane %v2336_v1, 6  ;;  %v1583_v11 = vrot.slane %v2337_v25, 4  ;;  %v374_v1 = vsel %vm336_vm2, %v1341_v15, %v1345_v18  ;;  %v2340_v25 = vperm.slane %v1176_v8, 4 }
  0x36   :  { %2334 = vst [vmem:[#allocation31_spill] sm:$0xff] %v1571_v30  ;;  %v373_v3 = vsel %vm334_vm1, %v2339_v12, %v1337_v14  ;;  %v1597_v30 = vsel %vm338_vm3, %v340_v5, %v341_v57  ;;  %v2341_v5 = vperm.slane %v1186_v17, 0  ;;  %v380_v8 = vsel %vm336_vm2, %v1365_v24, %v1369_v27 }
  0x37   :  { %v376_v21 = vsel %vm334_vm1, %v2340_v25, %v1349_v19  ;;  %v1610_v61 = vsel %vm338_vm3, %v373_v3, %v374_v1  ;;  %v2342_v19 = vperm.slane %v1186_v17, 4  ;;  %v383_v22 = vsel %vm336_vm2, %v1377_v29, %v1381_v31  ;;  %v2351_v25 = vld [vmem:[#allocation15_spill] sm:$0xff] }
  0x38   :  { %v1613_v14 = vsel %vm338_vm3, %v376_v21, %v377_v13  ;;  %v379_v15 = vsel %vm334_vm1, %v2341_v5, %v1361_v23  ;;  %v2343_v57 = vperm.slane %v1196_v26, 0  ;;  %v386_v24 = vsel %vm336_vm2, %v1389_v33, %v1393_v36 }
  0x39   :  { %v1623_v18 = vsel %vm338_vm3, %v379_v15, %v380_v8  ;;  %v382_v20 = vsel %vm334_vm1, %v2342_v19, %v1373_v28  ;;  %v2344_v17 = vperm.slane %v1196_v26, 4  ;;  %v389_v28 = vsel %vm336_vm2, %v1401_v38, %v1405_v40  ;;  %v2355_v15 = vld [vmem:[#allocation18_spill] sm:$0xff]  ;;  %v2357_v8 = vld [vmem:[#allocation20_spill] sm:$0xff]  ;;  %v2358_v19 = vld [vmem:[#allocation19_spill] sm:$0xff] }
  0x3a   :  { %v385_v23 = vsel %vm334_vm1, %v2343_v57, %v1385_v32  ;;  %v1637_v12 = vsel %vm338_vm3, %v382_v20, %v383_v22  ;;  %v2345_v32 = vperm.slane %v1206_v35, 0  ;;  %v392_v26 = vsel %vm336_vm2, %v1413_v42, %v1417_v45  ;;  %v2359_v22 = vld [vmem:[#allocation21_spill] sm:$0xff] }
  0x3b   :  { %v388_v27 = vsel %vm334_vm1, %v2344_v17, %v1397_v37  ;;  %v1650_v29 = vsel %vm338_vm3, %v385_v23, %v386_v24  ;;  %v2346_v37 = vperm.slane %v1206_v35, 4  ;;  %v395_v40 = vsel %vm336_vm2, %v1425_v47, %v1429_v49  ;;  %v2361_v24 = vld [vmem:[#allocation23_spill] sm:$0xff]  ;;  %v2362_v17 = vld [vmem:[#allocation22_spill] sm:$0xff] }
  0x3c   :  { %v1653_v31 = vsel %vm338_vm3, %v388_v27, %v389_v28  ;;  %v391_v33 = vsel %vm334_vm1, %v2345_v32, %v1409_v41  ;;  %v2347_v3 = vperm.slane %v1216_v44, 0  ;;  %v398_v42 = vsel %vm336_vm2, %v1437_v51, %v1441_v54  ;;  %v46_v27 = vld [vmem:[#allocation2] sm:$0xff] }
  0x3d   :  { %v1663_v36 = vsel %vm338_vm3, %v391_v33, %v392_v26  ;;  %v394_v38 = vsel %vm334_vm1, %v2346_v37, %v1421_v46  ;;  %v2348_v35 = vperm.slane %v1216_v44, 4  ;;  %v401_v46 = vsel %vm336_vm2, %v1449_v56, %v1453_v58  ;;  %v2363_v32 = vld [vmem:[#allocation24_spill] sm:$0xff]  ;;  %v2365_v37 = vld [vmem:[#allocation25_spill] sm:$0xff] }
  0x3e   :  { %v397_v41 = vsel %vm334_vm1, %v2347_v3, %v1433_v50  ;;  %v1677_v1 = vsel %vm338_vm3, %v394_v38, %v395_v40  ;;  %v2349_v50 = vperm.slane %v1226_v53, 0  ;;  %v404_v44 = vsel %vm336_vm2, %v1461_v60, %v1465_v63  ;;  %v2353_v60 = vld [vmem:[#allocation17_spill] sm:$0xff]  ;;  %v2354_v63 = vld [vmem:[#allocation16_spill] sm:$0xff] }
  0x3f   :  { %v400_v45 = vsel %vm334_vm1, %v2348_v35, %v1445_v55  ;;  %v1690_v47 = vsel %vm338_vm3, %v397_v41, %v398_v42  ;;  %v2350_v55 = vperm.slane %v1226_v53, 4  ;;  %v407_v58 = vsel %vm336_vm2, %v1473_v16, %v1477_v7  ;;  %v47_v41 = vld [vmem:[#allocation2 + $0x8] sm:$0xff]  ;;  %v2367_v35 = vld [vmem:[#allocation27_spill] sm:$0xff] }
  0x40   :  { %v1693_v49 = vsel %vm338_vm3, %v400_v45, %v401_v46  ;;  %v403_v51 = vsel %vm334_vm1, %v2349_v50, %v1457_v59  ;;  %v2352_v21 = vperm.slane %v1236_v62, 0  ;;  %v410_v5 = vsel %vm336_vm2, %v2354_v63, %v2353_v60  ;;  %v2368_v45 = vld [vmem:[#allocation26_spill] sm:$0xff] }
  0x41   :  { %v1703_v54 = vsel %vm338_vm3, %v403_v51, %v404_v44  ;;  %v406_v56 = vsel %vm334_vm1, %v2350_v55, %v1469_v0  ;;  %v2356_v53 = vperm.slane %v1236_v62, 4  ;;  %v413_v16 = vsel %vm336_vm2, %v2358_v19, %v2357_v8  ;;  %v2371_v44 = vld [vmem:[#allocation30_spill] sm:$0xff]  ;;  %v1801_v19 = vld [vmem:[#allocation4 + $0x18] sm:$0xff] }
  0x42   :  { %v409_v59 = vsel %vm334_vm1, %v2352_v21, %v2351_v25  ;;  %v1717_v13 = vsel %vm338_vm3, %v406_v56, %v407_v58  ;;  %v2360_v57 = vperm.slane %v1246_v39, 0  ;;  %v416_v62 = vsel %vm336_vm2, %v2362_v17, %v2361_v24  ;;  %v1769_v56 = vld [vmem:[#allocation4 + $0x10] sm:$0xff]  ;;  %v2381_v17 = vld [vmem:[#allocation12_spill] sm:$0xff] }
  0x43   :  { %v412_v0 = vsel %vm334_vm1, %v2356_v53, %v2355_v15  ;;  %v1730_v7 = vsel %vm338_vm3, %v409_v59, %v410_v5  ;;  %v2364_v33 = vperm.slane %v1246_v39, 4  ;;  %v419_v38 = vsel %vm336_vm2, %v2365_v37, %v1525_v10  ;;  %v2369_v39 = vld [vmem:[#allocation28_spill] sm:$0xff]  ;;  %v2372_v10 = vld [vmem:[#allocation29_spill] sm:$0xff] }
  0x44   :  { %v1733_v20 = vsel %vm338_vm3, %v412_v0, %v413_v16  ;;  %v415_v23 = vsel %vm334_vm1, %v2360_v57, %v2359_v22  ;;  %v2366_v40 = vperm.slane %v1256_v48, 0  ;;  %v422_v46 = vsel %vm336_vm2, %v2368_v45, %v2367_v35  ;;  %v2376_v16 = vld [vmem:[#allocation9_spill] sm:$0xff]  ;;  %v2379_v22 = vld [vmem:[#allocation11_spill] sm:$0xff]  ;;  %v2380_v57 = vld [vmem:[#allocation10_spill] sm:$0xff] }
  0x45   :  { %v1743_v28 = vsel %vm338_vm3, %v415_v23, %v416_v62  ;;  %v418_v26 = vsel %vm334_vm1, %v2364_v33, %v2363_v32  ;;  %v2370_v50 = vperm.slane %v1256_v48, 4  ;;  %v425_v55 = vsel %vm336_vm2, %v2372_v10, %v2371_v44  ;;  %v2374_v48 = vld [vmem:[#allocation31_spill] sm:$0xff]  ;;  %v2383_v32 = vld [vmem:[#allocation14_spill] sm:$0xff]  ;;  %v2384_v33 = vld [vmem:[#allocation13_spill] sm:$0xff] }
  0x46   :  { %v421_v3 = vsel %vm334_vm1, %v2366_v40, %v1529_v6  ;;  %v1757_v42 = vsel %vm338_vm3, %v418_v26, %v419_v38  ;;  %v2373_v25 = vperm.slane %v1266_v52, 0  ;;  %v428_v59 = vsel %vm336_vm2, %v2374_v48, %v1575_v9 }
  0x47   :  { %v424_v51 = vsel %vm334_vm1, %v2370_v50, %v2369_v39  ;;  %v1772_v6 = vsel %vm338_vm3, %v421_v3, %v422_v46  ;;  %v2375_v63 = vperm.slane %v1266_v52, 4  ;;  %v431_v15 = vsel %vm336_vm2, %v1583_v11, %v1587_v4  ;;  %v2377_v11 = vld [vmem:[#allocation8_spill] sm:$0xff]  ;;  %v48_v3 = vld [vmem:[#allocation2 + $0x10] sm:$0xff]  ;;  %v49_v39 = vld [vmem:[#allocation2 + $0x18] sm:$0xff] }
  0x48   :  { %v1775_v58 = vsel %vm338_vm3, %v424_v51, %v425_v55  ;;  %v427_v21 = vsel %vm334_vm1, %v2373_v25, %v1567_v43  ;;  %v465_v53 = vmul.f32 %v1590_v34, %v46_v27  ;;  %v466_v0 = vmul.f32 %v1597_v30, %v47_v41 }
  0x49   :  { %v1785_v60 = vsel %vm338_vm3, %v427_v21, %v428_v59  ;;  %v430_v5 = vsel %vm334_vm1, %v2375_v63, %v1579_v2  ;;  %v127_v9 = vperm.slane %v1769_v56, 1  ;;  %v128_v8 = vperm.slane %v1769_v56, 2 }
  0x4a   :  { %v1796_v43 = vsel %vm338_vm3, %v430_v5, %v431_v15  ;;  %529 = vst [vmem:[#allocation1] ss:$4 sm:$0xff] %v465_v53  ;;  %v129_v52 = vperm.slane %v1769_v56, 3  ;;  %v131_v2 = vperm.slane %v1769_v56, 5  ;;  %v2378_v4 = vperm.slane %v2377_v11, 0 }
  0x4b   :  { %v344_v30 = vsel %vm336_vm2, %v2380_v57, %v2379_v22  ;;  %531 = vst [vmem:[#allocation1 + $0x20] ss:$4 sm:$0xff] %v466_v0  ;;  %v132_v23 = vperm.slane %v1769_v56, 6  ;;  %v133_v24 = vperm.slane %v1769_v56, 7  ;;  %v2382_v62 = vperm.slane %v2377_v11, 4  ;;  %v1830_v0 = vld [vmem:[#allocation4 + $0x20] sm:$0xff] }
  0x4c   :  { %v343_v34 = vsel %vm334_vm1, %v2378_v4, %v2376_v16  ;;  %v347_v26 = vsel %vm336_vm2, %v2384_v33, %v2383_v32  ;;  %v126_v37 = vperm.slane %v1769_v56, 0  ;;  %v130_v38 = vperm.slane %v1769_v56, 4 }
  0x4d   :  { %v346_v27 = vsel %vm334_vm1, %v2382_v62, %v2381_v17  ;;  %v134_v40 = vperm.slane %v1801_v19, 0  ;;  %v135_v41 = vperm.slane %v1801_v19, 1  ;;  %v136_v35 = vperm.slane %v1801_v19, 2 }
  0x4e   :  { %v137_v45 = vperm.slane %v1801_v19, 3  ;;  %v345_v46 = vsel %vm338_vm3, %v343_v34, %v344_v30  ;;  %v138_v50 = vperm.slane %v1801_v19, 4  ;;  %v250_v51 = vrot.slane %v127_v9, 6 }
  0x4f   :  { %v251_v44 = vrot.slane %v128_v8, 4  ;;  %v348_v10 = vsel %vm338_vm3, %v346_v27, %v347_v26  ;;  %v252_v55 = vrot.slane %v129_v52, 2  ;;  %v253_v56 = vrot.slane %v131_v2, 6 }
  0x50   :  { %v254_v25 = vrot.slane %v132_v23, 4  ;;  %v255_v21 = vrot.slane %v133_v24, 2  ;;  %v467_v48 = vmul.f32 %v345_v46, %v48_v3  ;;  %v468_v5 = vmul.f32 %v348_v10, %v49_v39 }
  0x51   :  { %v532_v59 = vld.sshfl [vmem:[#allocation1] sm:$0xff pattern:$0x73625140]  ;;  %v533_v63 = vld.sshfl [vmem:[#allocation1 + $0x8] sm:$0xff pattern:$0x73625140]  ;;  %v349_v57 = vsel %vm334_vm1, %v126_v37, %v250_v51  ;;  %v350_v30 = vsel %vm336_vm2, %v251_v44, %v252_v55  ;;  %v352_v17 = vsel %vm334_vm1, %v130_v38, %v253_v56 }
  0x52   :  { %v534_v15 = vld.sshfl [vmem:[#allocation1 + $0x10] sm:$0xff pattern:$0x73625140]  ;;  %v535_v53 = vld.sshfl [vmem:[#allocation1 + $0x18] sm:$0xff pattern:$0x73625140]  ;;  %v353_v62 = vsel %vm336_vm2, %v254_v25, %v255_v21  ;;  %v351_v51 = vsel %vm338_vm3, %v349_v57, %v350_v30 }
  0x53   :  { %v536_v16 = vld.sshfl [vmem:[#allocation1 + $0x20] sm:$0xff pattern:$0x73625140]  ;;  %v537_v11 = vld.sshfl [vmem:[#allocation1 + $0x28] sm:$0xff pattern:$0x73625140]  ;;  %v354_v56 = vsel %vm338_vm3, %v352_v17, %v353_v62 }
  0x54   :  { %v538_v4 = vld.sshfl [vmem:[#allocation1 + $0x30] sm:$0xff pattern:$0x73625140]  ;;  %v539_v34 = vld.sshfl [vmem:[#allocation1 + $0x38] sm:$0xff pattern:$0x73625140] }
  0x55   :  { %v139_v9 = vperm.slane %v1801_v19, 5  ;;  %540 = vst [vmem:[#allocation1] ss:$4 sm:$0xff] %v467_v48  ;;  %v818_v8 = vsel %vm334_vm1, %v532_v59, 0.0  ;;  %v819_v52 = vsel %vm334_vm1, %v533_v63, 0.0  ;;  %v821_v2 = vsel %vm334_vm1, %v534_v15, 0.0 }
  0x56   :  { %v140_v22 = vperm.slane %v1801_v19, 6  ;;  %541 = vst [vmem:[#allocation1 + $0x20] ss:$4 sm:$0xff] %v468_v5  ;;  %v820_v23 = vadd.f32 %v819_v52, %v818_v8  ;;  %v141_v24 = vperm.slane %v1801_v19, 7  ;;  %v823_v27 = vsel %vm334_vm1, %v535_v53, 0.0  ;;  %v50_v37 = vld [vmem:[#allocation2 + $0x20] sm:$0xff] }
  0x57   :  { %v142_v32 = vperm.slane %v1830_v0, 0  ;;  %v143_v33 = vperm.slane %v1830_v0, 1  ;;  %v144_v26 = vperm.slane %v1830_v0, 2  ;;  %v145_v46 = vperm.slane %v1830_v0, 3  ;;  %v51_v38 = vld [vmem:[#allocation2 + $0x28] sm:$0xff] }
  0x58   :  { %v822_v3 = vadd.f32 %v821_v2, %v820_v23  ;;  %v256_v39 = vrot.slane %v135_v41, 6  ;;  %v825_v44 = vsel %vm334_vm1, %v536_v16, 0.0  ;;  %v257_v10 = vrot.slane %v136_v35, 4  ;;  %v1853_v35 = vld [vmem:[#allocation4 + $0x28] sm:$0xff] }
  0x59   :  { %v258_v55 = vrot.slane %v137_v45, 2  ;;  %v259_v21 = vrot.slane %v139_v9, 6  ;;  %v260_v48 = vrot.slane %v140_v22, 4  ;;  %v261_v59 = vrot.slane %v141_v24, 2 }
  0x5a   :  { %v824_v25 = vadd.f32 %v823_v27, %v822_v3  ;;  %v827_v63 = vsel %vm334_vm1, %v537_v11, 0.0  ;;  %v469_v5 = vmul.f32 %v351_v51, %v50_v37  ;;  %v829_v41 = vsel %vm334_vm1, %v538_v4, 0.0 }
  0x5b   :  { %v831_v8 = vsel %vm334_vm1, %v539_v34, 0.0  ;;  %v470_v52 = vmul.f32 %v354_v56, %v51_v38  ;;  %v146_v23 = vperm.slane %v1830_v0, 4  ;;  %v147_v4 = vperm.slane %v1830_v0, 5 }
  0x5c   :  { %v542_v15 = vld.sshfl [vmem:[#allocation1] sm:$0xff pattern:$0x73625140]  ;;  %v826_v53 = vadd.f32 %v825_v44, %v824_v25  ;;  %v543_v16 = vld.sshfl [vmem:[#allocation1 + $0x8] sm:$0xff pattern:$0x73625140]  ;;  %v355_v34 = vsel %vm334_vm1, %v134_v40, %v256_v39  ;;  %v356_v17 = vsel %vm336_vm2, %v257_v10, %v258_v55  ;;  %v358_v3 = vsel %vm334_vm1, %v138_v50, %v259_v21 }
  0x5d   :  { %v544_v2 = vld.sshfl [vmem:[#allocation1 + $0x10] sm:$0xff pattern:$0x73625140]  ;;  %v545_v45 = vld.sshfl [vmem:[#allocation1 + $0x18] sm:$0xff pattern:$0x73625140]  ;;  %v359_v37 = vsel %vm336_vm2, %v260_v48, %v261_v59  ;;  %v357_v19 = vsel %vm338_vm3, %v355_v34, %v356_v17 }
  0x5e   :  { %v546_v57 = vld.sshfl [vmem:[#allocation1 + $0x20] sm:$0xff pattern:$0x73625140]  ;;  %v828_v30 = vadd.f32 %v827_v63, %v826_v53  ;;  %v547_v9 = vld.sshfl [vmem:[#allocation1 + $0x28] sm:$0xff pattern:$0x73625140]  ;;  %v360_v59 = vsel %vm338_vm3, %v358_v3, %v359_v37 }
  0x5f   :  { %v548_v22 = vld.sshfl [vmem:[#allocation1 + $0x30] sm:$0xff pattern:$0x73625140]  ;;  %v1856_v11 = vld.sshfl [vmem:[#allocation1 + $0x38] sm:$0xff pattern:$0x73625140] }
  0x60   :  { %550 = vst [vmem:[#allocation1] ss:$4 sm:$0xff] %v469_v5  ;;  %v830_v24 = vadd.f32 %v829_v41, %v828_v30  ;;  %v833_v62 = vsel %vm334_vm1, %v542_v15, 0.0  ;;  %v148_v27 = vperm.slane %v1830_v0, 6  ;;  %v149_v44 = vperm.slane %v1830_v0, 7  ;;  %v52_v10 = vld [vmem:[#allocation2 + $0x30] sm:$0xff] }
  0x61   :  { %551 = vst [vmem:[#allocation1 + $0x20] ss:$4 sm:$0xff] %v470_v52  ;;  %v151_v38 = vperm.slane %v1853_v35, 1  ;;  %v152_v40 = vperm.slane %v1853_v35, 2  ;;  %v835_v39 = vsel %vm334_vm1, %v543_v16, 0.0  ;;  %v153_v55 = vperm.slane %v1853_v35, 3 }
  0x62   :  { %v832_v51 = vadd.f32 %v831_v8, %v830_v24  ;;  %v155_v56 = vperm.slane %v1853_v35, 5  ;;  %v53_v50 = vld [vmem:[#allocation2 + $0x38] sm:$0xff]  ;;  %v262_v21 = vrot.slane %v143_v33, 6  ;;  %v263_v48 = vrot.slane %v144_v26, 4 }
  0x63   :  { %v837_v63 = vsel %vm334_vm1, %v544_v2, 0.0  ;;  %v264_v5 = vrot.slane %v145_v46, 2  ;;  %v265_v15 = vrot.slane %v147_v4, 6  ;;  %v266_v53 = vrot.slane %v148_v27, 4 }
  0x64   :  { %v834_v25 = vadd.f32 %v833_v62, %v832_v51  ;;  %v267_v8 = vrot.slane %v149_v44, 2  ;;  %v471_v52 = vmul.f32 %v357_v19, %v52_v10  ;;  %v839_v16 = vsel %vm334_vm1, %v545_v45, 0.0 }
  0x65   :  { %v841_v30 = vsel %vm334_vm1, %v546_v57, 0.0  ;;  %v472_v24 = vmul.f32 %v360_v59, %v53_v50  ;;  %v843_v4 = vsel %vm334_vm1, %v547_v9, 0.0  ;;  %v156_v27 = vperm.slane %v1853_v35, 6  ;;  %v54_v59 = vld [vmem:[#allocation2 + $0x40] sm:$0xff] }
  0x66   :  { %v836_v41 = vadd.f32 %v835_v39, %v834_v25  ;;  %v361_v45 = vsel %vm334_vm1, %v142_v32, %v262_v21  ;;  %v362_v57 = vsel %vm336_vm2, %v263_v48, %v264_v5  ;;  %v157_v39 = vperm.slane %v1853_v35, 7  ;;  %v55_v48 = vld [vmem:[#allocation2 + $0x48] sm:$0xff] }
  0x67   :  { %v552_v34 = vld.sshfl [vmem:[#allocation1] sm:$0xff pattern:$0x73625140]  ;;  %v553_v17 = vld.sshfl [vmem:[#allocation1 + $0x8] sm:$0xff pattern:$0x73625140]  ;;  %v364_v10 = vsel %vm334_vm1, %v146_v23, %v265_v15  ;;  %v365_v19 = vsel %vm336_vm2, %v266_v53, %v267_v8  ;;  %v363_v32 = vsel %vm338_vm3, %v361_v45, %v362_v57 }
  0x68   :  { %v554_v62 = vld.sshfl [vmem:[#allocation1 + $0x10] sm:$0xff pattern:$0x73625140]  ;;  %v838_v33 = vadd.f32 %v837_v63, %v836_v41  ;;  %v555_v26 = vld.sshfl [vmem:[#allocation1 + $0x18] sm:$0xff pattern:$0x73625140]  ;;  %v366_v23 = vsel %vm338_vm3, %v364_v10, %v365_v19 }
  0x69   :  { %v556_v51 = vld.sshfl [vmem:[#allocation1 + $0x20] sm:$0xff pattern:$0x73625140]  ;;  %v557_v3 = vld.sshfl [vmem:[#allocation1 + $0x28] sm:$0xff pattern:$0x73625140] }
  0x6a   :  { %v558_v37 = vld.sshfl [vmem:[#allocation1 + $0x30] sm:$0xff pattern:$0x73625140]  ;;  %v840_v2 = vadd.f32 %v839_v16, %v838_v33  ;;  %v559_v46 = vld.sshfl [vmem:[#allocation1 + $0x38] sm:$0xff pattern:$0x73625140]  ;;  %v473_v16 = vmul.f32 %v363_v32, %v54_v59 }
  0x6b   :  { %560 = vst [vmem:[#allocation1] ss:$4 sm:$0xff] %v471_v52  ;;  %v845_v25 = vsel %vm334_vm1, %v548_v22, 0.0  ;;  %v150_v9 = vperm.slane %v1853_v35, 0  ;;  %v154_v0 = vperm.slane %v1853_v35, 4  ;;  %v268_v63 = vrot.slane %v151_v38, 6 }
  0x6c   :  { %561 = vst [vmem:[#allocation1 + $0x20] ss:$4 sm:$0xff] %v472_v24  ;;  %v842_v44 = vadd.f32 %v841_v30, %v840_v2  ;;  %v847_v21 = vsel %vm334_vm1, %v1856_v11, 0.0  ;;  %v269_v5 = vrot.slane %v152_v40, 4  ;;  %v270_v41 = vrot.slane %v153_v55, 2  ;;  %v57_v32 = vld [vmem:[#allocation2 + $0x58] sm:$0xff] }
  0x6d   :  { %v271_v53 = vrot.slane %v155_v56, 6  ;;  %v272_v22 = vrot.slane %v156_v27, 4  ;;  %v273_v8 = vrot.slane %v157_v39, 2  ;;  %v849_v52 = vsel %vm334_vm1, %v552_v34, 0.0 }
  0x6e   :  { %v844_v50 = vadd.f32 %v843_v4, %v842_v44  ;;  %v851_v35 = vsel %vm334_vm1, %v553_v17, 0.0  ;;  %v853_v38 = vsel %vm334_vm1, %v554_v62, 0.0  ;;  %v474_v24 = vmul.f32 %v366_v23, %v55_v48 }
  0x6f   :  { %v367_v34 = vsel %vm334_vm1, %v150_v9, %v268_v63  ;;  %v368_v44 = vsel %vm336_vm2, %v269_v5, %v270_v41  ;;  %v855_v17 = vsel %vm334_vm1, %v555_v26, 0.0  ;;  %v370_v62 = vsel %vm334_vm1, %v154_v0, %v271_v53 }
  0x70   :  { %v846_v15 = vadd.f32 %v845_v25, %v844_v50  ;;  %v371_v39 = vsel %vm336_vm2, %v272_v22, %v273_v8  ;;  %v857_v19 = vsel %vm334_vm1, %v556_v51, 0.0  ;;  %v56_v25 = vld [vmem:[#allocation2 + $0x50] sm:$0xff]  ;;  %v369_v50 = vsel %vm338_vm3, %v367_v34, %v368_v44 }
  0x71   :  { %v859_v9 = vsel %vm334_vm1, %v557_v3, 0.0  ;;  %v475_v48 = vmul.f32 %v369_v50, %v56_v25  ;;  %v861_v26 = vsel %vm334_vm1, %v558_v37, 0.0  ;;  %v863_v0 = vsel %vm334_vm1, %v559_v46, 0.0 }
  0x72   :  { %v848_v30 = vadd.f32 %v847_v21, %v846_v15  ;;  %v562_v33 = vld.sshfl [vmem:[#allocation1] sm:$0xff pattern:$0x73625140]  ;;  %v563_v11 = vld.sshfl [vmem:[#allocation1 + $0x8] sm:$0xff pattern:$0x73625140]  ;;  %v372_v21 = vsel %vm338_vm3, %v370_v62, %v371_v39 }
  0x73   :  { %v564_v2 = vld.sshfl [vmem:[#allocation1 + $0x10] sm:$0xff pattern:$0x73625140]  ;;  %v565_v40 = vld.sshfl [vmem:[#allocation1 + $0x18] sm:$0xff pattern:$0x73625140]  ;;  %v476_v5 = vmul.f32 %v372_v21, %v57_v32 }
  0x74   :  { %v566_v55 = vld.sshfl [vmem:[#allocation1 + $0x20] sm:$0xff pattern:$0x73625140]  ;;  %v850_v4 = vadd.f32 %v849_v52, %v848_v30  ;;  %v567_v45 = vld.sshfl [vmem:[#allocation1 + $0x28] sm:$0xff pattern:$0x73625140] }
  0x75   :  { %v568_v57 = vld.sshfl [vmem:[#allocation1 + $0x30] sm:$0xff pattern:$0x73625140]  ;;  %v569_v56 = vld.sshfl [vmem:[#allocation1 + $0x38] sm:$0xff pattern:$0x73625140] }
  0x76   :  { %570 = vst [vmem:[#allocation1] ss:$4 sm:$0xff] %v473_v16  ;;  %v852_v27 = vadd.f32 %v851_v35, %v850_v4  ;;  %v865_v3 = vsel %vm334_vm1, %v562_v33, 0.0  ;;  %v867_v46 = vsel %vm334_vm1, %v563_v11, 0.0  ;;  %v59_v4 = vld [vmem:[#allocation2 + $0x68] sm:$0xff]  ;;  %v871_v34 = vsel %vm334_vm1, %v565_v40, 0.0 }
  0x77   :  { %571 = vst [vmem:[#allocation1 + $0x20] ss:$4 sm:$0xff] %v474_v24  ;;  %v869_v24 = vsel %vm334_vm1, %v564_v2, 0.0  ;;  %v873_v62 = vsel %vm334_vm1, %v566_v55, 0.0  ;;  %v875_v39 = vsel %vm334_vm1, %v567_v45, 0.0  ;;  %v478_v33 = vmul.f32 %v1613_v14, %v59_v4  ;;  %v60_v21 = vld [vmem:[#allocation2 + $0x70] sm:$0xff] }
  0x78   :  { %v854_v10 = vadd.f32 %v853_v38, %v852_v27  ;;  %v58_v38 = vld [vmem:[#allocation2 + $0x60] sm:$0xff]  ;;  %v877_v45 = vsel %vm334_vm1, %v568_v57, 0.0  ;;  %v879_v32 = vsel %vm334_vm1, %v569_v56, 0.0 }
  0x79   :  { %v477_v44 = vmul.f32 %v1610_v61, %v58_v38 }
  0x7a   :  { %v856_v59 = vadd.f32 %v855_v17, %v854_v10 }
  0x7c   :  { %v858_v63 = vadd.f32 %v857_v19, %v856_v59 }
  0x7d   :  { %v572_v41 = vld.sshfl [vmem:[#allocation1] sm:$0xff pattern:$0x73625140]  ;;  %v573_v23 = vld.sshfl [vmem:[#allocation1 + $0x8] sm:$0xff pattern:$0x73625140] }
  0x7e   :  { %v574_v15 = vld.sshfl [vmem:[#allocation1 + $0x10] sm:$0xff pattern:$0x73625140]  ;;  %v860_v51 = vadd.f32 %v859_v9, %v858_v63  ;;  %v575_v53 = vld.sshfl [vmem:[#allocation1 + $0x18] sm:$0xff pattern:$0x73625140] }
  0x7f   :  { %v576_v22 = vld.sshfl [vmem:[#allocation1 + $0x20] sm:$0xff pattern:$0x73625140]  ;;  %v577_v8 = vld.sshfl [vmem:[#allocation1 + $0x28] sm:$0xff pattern:$0x73625140] }
  0x80   :  { %v1910_v52 = vld.sshfl [vmem:[#allocation1 + $0x30] sm:$0xff pattern:$0x73625140]  ;;  %v862_v16 = vadd.f32 %v861_v26, %v860_v51  ;;  %v1912_v30 = vld.sshfl [vmem:[#allocation1 + $0x38] sm:$0xff pattern:$0x73625140] }
  0x81   :  { %580 = vst [vmem:[#allocation1] ss:$4 sm:$0xff] %v475_v48  ;;  %v61_v63 = vld [vmem:[#allocation2 + $0x78] sm:$0xff]  ;;  %v881_v48 = vsel %vm334_vm1, %v572_v41, 0.0  ;;  %v885_v51 = vsel %vm334_vm1, %v574_v15, 0.0 }
  0x82   :  { %581 = vst [vmem:[#allocation1 + $0x20] ss:$4 sm:$0xff] %v476_v5  ;;  %v864_v37 = vadd.f32 %v863_v0, %v862_v16  ;;  %v479_v0 = vmul.f32 %v1623_v18, %v60_v21  ;;  %v883_v5 = vsel %vm334_vm1, %v573_v23, 0.0  ;;  %v480_v16 = vmul.f32 %v1637_v12, %v61_v63 }
  0x83   :  { %v887_v12 = vsel %vm334_vm1, %v575_v53, 0.0 }
  0x84   :  { %v866_v35 = vadd.f32 %v865_v3, %v864_v37 }
  0x86   :  { %v868_v27 = vadd.f32 %v867_v46, %v866_v35 }
  0x88   :  { %v870_v17 = vadd.f32 %v869_v24, %v868_v27  ;;  %v582_v10 = vld.sshfl [vmem:[#allocation1] sm:$0xff pattern:$0x73625140]  ;;  %v583_v19 = vld.sshfl [vmem:[#allocation1 + $0x8] sm:$0xff pattern:$0x73625140] }
  0x89   :  { %v584_v11 = vld.sshfl [vmem:[#allocation1 + $0x10] sm:$0xff pattern:$0x73625140]  ;;  %v1922_v25 = vld.sshfl [vmem:[#allocation1 + $0x18] sm:$0xff pattern:$0x73625140] }
  0x8a   :  { %v1924_v50 = vld.sshfl [vmem:[#allocation1 + $0x20] sm:$0xff pattern:$0x73625140]  ;;  %v872_v2 = vadd.f32 %v871_v34, %v870_v17  ;;  %v1926_v59 = vld.sshfl [vmem:[#allocation1 + $0x28] sm:$0xff pattern:$0x73625140] }
  0x8b   :  { %v1928_v40 = vld.sshfl [vmem:[#allocation1 + $0x30] sm:$0xff pattern:$0x73625140]  ;;  %v1930_v61 = vld.sshfl [vmem:[#allocation1 + $0x38] sm:$0xff pattern:$0x73625140] }
  0x8c   :  { %590 = vst [vmem:[#allocation1] ss:$4 sm:$0xff] %v477_v44  ;;  %v874_v55 = vadd.f32 %v873_v62, %v872_v2  ;;  %v889_v24 = vsel %vm334_vm1, %v576_v22, 0.0  ;;  %v62_v27 = vld [vmem:[#allocation2 + $0x80] sm:$0xff]  ;;  %v891_v34 = vsel %vm334_vm1, %v577_v8, 0.0  ;;  %v63_v44 = vld [vmem:[#allocation2 + $0x88] sm:$0xff] }
  0x8d   :  { %591 = vst [vmem:[#allocation1 + $0x20] ss:$4 sm:$0xff] %v478_v33  ;;  %v893_v62 = vsel %vm334_vm1, %v1910_v52, 0.0  ;;  %v895_v2 = vsel %vm334_vm1, %v1912_v30, 0.0  ;;  %v897_v53 = vsel %vm334_vm1, %v582_v10, 0.0  ;;  %v901_v63 = vsel %vm334_vm1, %v584_v11, 0.0 }
  0x8e   :  { %v876_v14 = vadd.f32 %v875_v39, %v874_v55  ;;  %v481_v39 = vmul.f32 %v1650_v29, %v62_v27  ;;  %v482_v55 = vmul.f32 %v1653_v31, %v63_v44  ;;  %v899_v31 = vsel %vm334_vm1, %v583_v19, 0.0 }
  0x8f   :  { %v911_v44 = vsel %vm334_vm1, %v1930_v61, 0.0 }
  0x90   :  { %v878_v9 = vadd.f32 %v877_v45, %v876_v14 }
  0x92   :  { %v880_v26 = vadd.f32 %v879_v32, %v878_v9 }
  0x93   :  { %v1939_v3 = vld.sshfl [vmem:[#allocation1] sm:$0xff pattern:$0x73625140]  ;;  %v1941_v57 = vld.sshfl [vmem:[#allocation1 + $0x8] sm:$0xff pattern:$0x73625140] }
  0x94   :  { %v1943_v37 = vld.sshfl [vmem:[#allocation1 + $0x10] sm:$0xff pattern:$0x73625140]  ;;  %v882_v56 = vadd.f32 %v881_v48, %v880_v26  ;;  %v1945_v46 = vld.sshfl [vmem:[#allocation1 + $0x18] sm:$0xff pattern:$0x73625140] }
  0x95   :  { %v1947_v35 = vld.sshfl [vmem:[#allocation1 + $0x20] sm:$0xff pattern:$0x73625140]  ;;  %v1949_v41 = vld.sshfl [vmem:[#allocation1 + $0x28] sm:$0xff pattern:$0x73625140] }
  0x96   :  { %v1951_v18 = vld.sshfl [vmem:[#allocation1 + $0x30] sm:$0xff pattern:$0x73625140]  ;;  %v884_v23 = vadd.f32 %v883_v5, %v882_v56  ;;  %v1953_v38 = vld.sshfl [vmem:[#allocation1 + $0x38] sm:$0xff pattern:$0x73625140] }
  0x97   :  { %600 = vst [vmem:[#allocation1] ss:$4 sm:$0xff] %v479_v0  ;;  %v64_v48 = vld [vmem:[#allocation2 + $0x90] sm:$0xff]  ;;  %v65_v0 = vld [vmem:[#allocation2 + $0x98] sm:$0xff]  ;;  %v903_v5 = vsel %vm334_vm1, %v1922_v25, 0.0  ;;  %v905_v56 = vsel %vm334_vm1, %v1924_v50, 0.0 }
  0x98   :  { %601 = vst [vmem:[#allocation1 + $0x20] ss:$4 sm:$0xff] %v480_v16  ;;  %v886_v15 = vadd.f32 %v885_v51, %v884_v23  ;;  %v483_v16 = vmul.f32 %v1663_v36, %v64_v48  ;;  %v907_v23 = vsel %vm334_vm1, %v1926_v59, 0.0  ;;  %v484_v19 = vmul.f32 %v1677_v1, %v65_v0 }
  0x99   :  { %v909_v1 = vsel %vm334_vm1, %v1928_v40, 0.0  ;;  %v917_v40 = vsel %vm334_vm1, %v1943_v37, 0.0 }
  0x9a   :  { %v888_v4 = vadd.f32 %v887_v12, %v886_v15 }
  0x9c   :  { %v890_v17 = vadd.f32 %v889_v24, %v888_v4 }
  0x9e   :  { %v892_v33 = vadd.f32 %v891_v34, %v890_v17  ;;  %v1965_v22 = vld.sshfl [vmem:[#allocation1] sm:$0xff pattern:$0x73625140]  ;;  %v1967_v45 = vld.sshfl [vmem:[#allocation1 + $0x8] sm:$0xff pattern:$0x73625140] }
  0x9f   :  { %v1969_v8 = vld.sshfl [vmem:[#allocation1 + $0x10] sm:$0xff pattern:$0x73625140]  ;;  %v1971_v14 = vld.sshfl [vmem:[#allocation1 + $0x18] sm:$0xff pattern:$0x73625140] }
  0xa0   :  { %v1973_v32 = vld.sshfl [vmem:[#allocation1 + $0x20] sm:$0xff pattern:$0x73625140]  ;;  %v894_v52 = vadd.f32 %v893_v62, %v892_v33  ;;  %v1975_v29 = vld.sshfl [vmem:[#allocation1 + $0x28] sm:$0xff pattern:$0x73625140] }
  0xa1   :  { %v1977_v21 = vld.sshfl [vmem:[#allocation1 + $0x30] sm:$0xff pattern:$0x73625140]  ;;  %v1979_v30 = vld.sshfl [vmem:[#allocation1 + $0x38] sm:$0xff pattern:$0x73625140] }
  0xa2   :  { %610 = vst [vmem:[#allocation1] ss:$4 sm:$0xff] %v481_v39  ;;  %v896_v10 = vadd.f32 %v895_v2, %v894_v52  ;;  %v66_v62 = vld [vmem:[#allocation2 + $0xa0] sm:$0xff]  ;;  %v913_v39 = vsel %vm334_vm1, %v1939_v3, 0.0  ;;  %v67_v33 = vld [vmem:[#allocation2 + $0xa8] sm:$0xff] }
  0xa3   :  { %611 = vst [vmem:[#allocation1 + $0x20] ss:$4 sm:$0xff] %v482_v55  ;;  %v485_v55 = vmul.f32 %v1690_v47, %v66_v62  ;;  %v486_v61 = vmul.f32 %v1693_v49, %v67_v33  ;;  %v921_v49 = vsel %vm334_vm1, %v1947_v35, 0.0 }
  0xa4   :  { %v898_v9 = vadd.f32 %v897_v53, %v896_v10  ;;  %v915_v53 = vsel %vm334_vm1, %v1941_v57, 0.0  ;;  %v919_v10 = vsel %vm334_vm1, %v1945_v46, 0.0 }
  0xa6   :  { %v900_v26 = vadd.f32 %v899_v31, %v898_v9 }
  0xa8   :  { %v902_v51 = vadd.f32 %v901_v63, %v900_v26 }
  0xa9   :  { %v1991_v12 = vld.sshfl [vmem:[#allocation1] sm:$0xff pattern:$0x73625140]  ;;  %v1993_v11 = vld.sshfl [vmem:[#allocation1 + $0x8] sm:$0xff pattern:$0x73625140] }
  0xaa   :  { %v1995_v15 = vld.sshfl [vmem:[#allocation1 + $0x10] sm:$0xff pattern:$0x73625140]  ;;  %v904_v24 = vadd.f32 %v903_v5, %v902_v51  ;;  %v1997_v4 = vld.sshfl [vmem:[#allocation1 + $0x18] sm:$0xff pattern:$0x73625140] }
  0xab   :  { %v1999_v25 = vld.sshfl [vmem:[#allocation1 + $0x20] sm:$0xff pattern:$0x73625140]  ;;  %v2001_v36 = vld.sshfl [vmem:[#allocation1 + $0x28] sm:$0xff pattern:$0x73625140] }
  0xac   :  { %v2003_v27 = vld.sshfl [vmem:[#allocation1 + $0x30] sm:$0xff pattern:$0x73625140]  ;;  %v906_v50 = vadd.f32 %v905_v56, %v904_v24  ;;  %v2005_v34 = vld.sshfl [vmem:[#allocation1 + $0x38] sm:$0xff pattern:$0x73625140] }
  0xad   :  { %620 = vst [vmem:[#allocation1] ss:$4 sm:$0xff] %v483_v16  ;;  %v923_v5 = vsel %vm334_vm1, %v1949_v41, 0.0  ;;  %v68_v51 = vld [vmem:[#allocation2 + $0xb0] sm:$0xff]  ;;  %v69_v56 = vld [vmem:[#allocation2 + $0xb8] sm:$0xff] }
  0xae   :  { %621 = vst [vmem:[#allocation1 + $0x20] ss:$4 sm:$0xff] %v484_v19  ;;  %v908_v59 = vadd.f32 %v907_v23, %v906_v50  ;;  %v925_v23 = vsel %vm334_vm1, %v1951_v18, 0.0  ;;  %v487_v24 = vmul.f32 %v1703_v54, %v68_v51  ;;  %v927_v50 = vsel %vm334_vm1, %v1953_v38, 0.0 }
  0xaf   :  { %v488_v35 = vmul.f32 %v1717_v13, %v69_v56  ;;  %v931_v13 = vsel %vm334_vm1, %v1967_v45, 0.0  ;;  %v939_v45 = vsel %vm334_vm1, %v1975_v29, 0.0 }
  0xb0   :  { %v910_v17 = vadd.f32 %v909_v1, %v908_v59  ;;  %v929_v1 = vsel %vm334_vm1, %v1965_v22, 0.0 }
  0xb2   :  { %v912_v2 = vadd.f32 %v911_v44, %v910_v17 }
  0xb4   :  { %v914_v52 = vadd.f32 %v913_v39, %v912_v2  ;;  %v2021_v31 = vld.sshfl [vmem:[#allocation1] sm:$0xff pattern:$0x73625140]  ;;  %v2023_v9 = vld.sshfl [vmem:[#allocation1 + $0x8] sm:$0xff pattern:$0x73625140] }
  0xb5   :  { %v2025_v3 = vld.sshfl [vmem:[#allocation1 + $0x10] sm:$0xff pattern:$0x73625140]  ;;  %v2027_v63 = vld.sshfl [vmem:[#allocation1 + $0x18] sm:$0xff pattern:$0x73625140] }
  0xb6   :  { %v2029_v57 = vld.sshfl [vmem:[#allocation1 + $0x20] sm:$0xff pattern:$0x73625140]  ;;  %v916_v47 = vadd.f32 %v915_v53, %v914_v52  ;;  %v2031_v48 = vld.sshfl [vmem:[#allocation1 + $0x28] sm:$0xff pattern:$0x73625140] }
  0xb7   :  { %v2033_v26 = vld.sshfl [vmem:[#allocation1 + $0x30] sm:$0xff pattern:$0x73625140]  ;;  %v2035_v37 = vld.sshfl [vmem:[#allocation1 + $0x38] sm:$0xff pattern:$0x73625140] }
  0xb8   :  { %630 = vst [vmem:[#allocation1] ss:$4 sm:$0xff] %v485_v55  ;;  %v918_v46 = vadd.f32 %v917_v40, %v916_v47  ;;  %v933_v2 = vsel %vm334_vm1, %v1969_v8, 0.0  ;;  %v70_v55 = vld [vmem:[#allocation2 + $0xc0] sm:$0xff]  ;;  %v935_v52 = vsel %vm334_vm1, %v1971_v14, 0.0  ;;  %v71_v40 = vld [vmem:[#allocation2 + $0xc8] sm:$0xff] }
  0xb9   :  { %631 = vst [vmem:[#allocation1 + $0x20] ss:$4 sm:$0xff] %v486_v61  ;;  %v937_v61 = vsel %vm334_vm1, %v1973_v32, 0.0  ;;  %v489_v47 = vmul.f32 %v1730_v7, %v70_v55  ;;  %v490_v8 = vmul.f32 %v1733_v20, %v71_v40  ;;  %v943_v20 = vsel %vm334_vm1, %v1979_v30, 0.0 }
  0xba   :  { %v920_v0 = vadd.f32 %v919_v10, %v918_v46 }
  0xbc   :  { %v922_v16 = vadd.f32 %v921_v49, %v920_v0  ;;  %v941_v49 = vsel %vm334_vm1, %v1977_v21, 0.0 }
  0xbe   :  { %v924_v19 = vadd.f32 %v923_v5, %v922_v16 }
  0xbf   :  { %v2049_v59 = vld.sshfl [vmem:[#allocation1] sm:$0xff pattern:$0x73625140]  ;;  %v2051_v41 = vld.sshfl [vmem:[#allocation1 + $0x8] sm:$0xff pattern:$0x73625140] }
  0xc0   :  { %v2053_v44 = vld.sshfl [vmem:[#allocation1 + $0x10] sm:$0xff pattern:$0x73625140]  ;;  %v926_v17 = vadd.f32 %v925_v23, %v924_v19  ;;  %v2055_v62 = vld.sshfl [vmem:[#allocation1 + $0x18] sm:$0xff pattern:$0x73625140] }
  0xc1   :  { %v2057_v18 = vld.sshfl [vmem:[#allocation1 + $0x20] sm:$0xff pattern:$0x73625140]  ;;  %v2059_v54 = vld.sshfl [vmem:[#allocation1 + $0x28] sm:$0xff pattern:$0x73625140] }
  0xc2   :  { %v2061_v39 = vld.sshfl [vmem:[#allocation1 + $0x30] sm:$0xff pattern:$0x73625140]  ;;  %v928_v38 = vadd.f32 %v927_v50, %v926_v17  ;;  %v2063_v33 = vld.sshfl [vmem:[#allocation1 + $0x38] sm:$0xff pattern:$0x73625140] }
  0xc3   :  { %640 = vst [vmem:[#allocation1] ss:$4 sm:$0xff] %v487_v24  ;;  %v945_v19 = vsel %vm334_vm1, %v1991_v12, 0.0  ;;  %v72_v24 = vld [vmem:[#allocation2 + $0xd0] sm:$0xff] }
  0xc4   :  { %641 = vst [vmem:[#allocation1 + $0x20] ss:$4 sm:$0xff] %v488_v35  ;;  %v930_v22 = vadd.f32 %v929_v1, %v928_v38  ;;  %v73_v1 = vld [vmem:[#allocation2 + $0xd8] sm:$0xff]  ;;  %v947_v35 = vsel %vm334_vm1, %v1993_v11, 0.0  ;;  %v491_v38 = vmul.f32 %v1743_v28, %v72_v24 }
  0xc5   :  { %v492_v30 = vmul.f32 %v1757_v42, %v73_v1  ;;  %v953_v42 = vsel %vm334_vm1, %v1999_v25, 0.0  ;;  %v961_v25 = vsel %vm334_vm1, %v2021_v31, 0.0 }
  0xc6   :  { %v932_v53 = vadd.f32 %v931_v13, %v930_v22  ;;  %v949_v13 = vsel %vm334_vm1, %v1995_v15, 0.0  ;;  %v951_v22 = vsel %vm334_vm1, %v1997_v4, 0.0 }
  0xc8   :  { %v934_v10 = vadd.f32 %v933_v2, %v932_v53 }
  0xca   :  { %v936_v46 = vadd.f32 %v935_v52, %v934_v10  ;;  %v2079_v0 = vld.sshfl [vmem:[#allocation1] sm:$0xff pattern:$0x73625140]  ;;  %v2081_v5 = vld.sshfl [vmem:[#allocation1 + $0x8] sm:$0xff pattern:$0x73625140] }
  0xcb   :  { %v2083_v14 = vld.sshfl [vmem:[#allocation1 + $0x10] sm:$0xff pattern:$0x73625140]  ;;  %v2085_v51 = vld.sshfl [vmem:[#allocation1 + $0x18] sm:$0xff pattern:$0x73625140] }
  0xcc   :  { %v2087_v32 = vld.sshfl [vmem:[#allocation1 + $0x20] sm:$0xff pattern:$0x73625140]  ;;  %v938_v7 = vadd.f32 %v937_v61, %v936_v46  ;;  %v2089_v16 = vld.sshfl [vmem:[#allocation1 + $0x28] sm:$0xff pattern:$0x73625140] }
  0xcd   :  { %v2091_v56 = vld.sshfl [vmem:[#allocation1 + $0x30] sm:$0xff pattern:$0x73625140]  ;;  %v2093_v29 = vld.sshfl [vmem:[#allocation1 + $0x38] sm:$0xff pattern:$0x73625140] }
  0xce   :  { %650 = vst [vmem:[#allocation1] ss:$4 sm:$0xff] %v489_v47  ;;  %v940_v21 = vadd.f32 %v939_v45, %v938_v7  ;;  %v955_v61 = vsel %vm334_vm1, %v2001_v36, 0.0  ;;  %v74_v46 = vld [vmem:[#allocation2 + $0xe0] sm:$0xff]  ;;  %v957_v45 = vsel %vm334_vm1, %v2003_v27, 0.0  ;;  %v959_v7 = vsel %vm334_vm1, %v2005_v34, 0.0 }
  0xcf   :  { %651 = vst [vmem:[#allocation1 + $0x20] ss:$4 sm:$0xff] %v490_v8 }
  0xd0   :  { %v942_v23 = vadd.f32 %v941_v49, %v940_v21  ;;  %v75_v49 = vld [vmem:[#allocation2 + $0xe8] sm:$0xff]  ;;  %v493_v21 = vmul.f32 %v1772_v6, %v74_v46 }
  0xd1   :  { %v494_v36 = vmul.f32 %v1775_v58, %v75_v49  ;;  %v965_v58 = vsel %vm334_vm1, %v2025_v3, 0.0 }
  0xd2   :  { %v944_v50 = vadd.f32 %v943_v20, %v942_v23  ;;  %v963_v23 = vsel %vm334_vm1, %v2023_v9, 0.0 }
  0xd4   :  { %v946_v17 = vadd.f32 %v945_v19, %v944_v50 }
  0xd5   :  { %v2107_v2 = vld.sshfl [vmem:[#allocation1] sm:$0xff pattern:$0x73625140]  ;;  %v2109_v12 = vld.sshfl [vmem:[#allocation1 + $0x8] sm:$0xff pattern:$0x73625140] }
  0xd6   :  { %v2111_v53 = vld.sshfl [vmem:[#allocation1 + $0x10] sm:$0xff pattern:$0x73625140]  ;;  %v948_v55 = vadd.f32 %v947_v35, %v946_v17  ;;  %v2113_v52 = vld.sshfl [vmem:[#allocation1 + $0x18] sm:$0xff pattern:$0x73625140] }
  0xd7   :  { %v2115_v11 = vld.sshfl [vmem:[#allocation1 + $0x20] sm:$0xff pattern:$0x73625140]  ;;  %v2117_v28 = vld.sshfl [vmem:[#allocation1 + $0x28] sm:$0xff pattern:$0x73625140] }
  0xd8   :  { %v2119_v40 = vld.sshfl [vmem:[#allocation1 + $0x30] sm:$0xff pattern:$0x73625140]  ;;  %v950_v15 = vadd.f32 %v949_v13, %v948_v55  ;;  %v2121_v10 = vld.sshfl [vmem:[#allocation1 + $0x38] sm:$0xff pattern:$0x73625140] }
  0xd9   :  { %660 = vst [vmem:[#allocation1] ss:$4 sm:$0xff] %v491_v38  ;;  %v967_v38 = vsel %vm334_vm1, %v2027_v63, 0.0  ;;  %v76_v13 = vld [vmem:[#allocation2 + $0xf0] sm:$0xff]  ;;  %v969_v55 = vsel %vm334_vm1, %v2029_v57, 0.0 }
  0xda   :  { %661 = vst [vmem:[#allocation1 + $0x20] ss:$4 sm:$0xff] %v492_v30  ;;  %v952_v4 = vadd.f32 %v951_v22, %v950_v15  ;;  %v77_v30 = vld [vmem:[#allocation2 + $0xf8] sm:$0xff] }
  0xdb   :  { %v496_v3 = vmul.f32 %v1796_v43, %v77_v30  ;;  %v975_v43 = vsel %vm334_vm1, %v2035_v37, 0.0  ;;  %v985_v37 = vsel %vm334_vm1, %v2057_v18, 0.0  ;;  %v995_v18 = vsel %vm334_vm1, %v2081_v5, 0.0 }
  0xdc   :  { %v954_v47 = vadd.f32 %v953_v42, %v952_v4  ;;  %v495_v42 = vmul.f32 %v1785_v60, %v76_v13  ;;  %v971_v4 = vsel %vm334_vm1, %v2031_v48, 0.0  ;;  %v1005_v5 = vsel %vm334_vm1, %v2091_v56, 0.0 }
  0xdd   :  { %v1015_v56 = vsel %vm334_vm1, %v2113_v52, 0.0 }
  0xde   :  { %v956_v8 = vadd.f32 %v955_v61, %v954_v47  ;;  %v973_v61 = vsel %vm334_vm1, %v2033_v26, 0.0 }
  0xe0   :  { %v958_v20 = vadd.f32 %v957_v45, %v956_v8  ;;  %v2137_v19 = vld.sshfl [vmem:[#allocation1] sm:$0xff pattern:$0x73625140]  ;;  %v2139_v24 = vld.sshfl [vmem:[#allocation1 + $0x8] sm:$0xff pattern:$0x73625140] }
  0xe1   :  { %v2141_v27 = vld.sshfl [vmem:[#allocation1 + $0x10] sm:$0xff pattern:$0x73625140]  ;;  %v2143_v50 = vld.sshfl [vmem:[#allocation1 + $0x18] sm:$0xff pattern:$0x73625140] }
  0xe2   :  { %v2145_v34 = vld.sshfl [vmem:[#allocation1 + $0x20] sm:$0xff pattern:$0x73625140]  ;;  %v960_v6 = vadd.f32 %v959_v7, %v958_v20  ;;  %v2147_v1 = vld.sshfl [vmem:[#allocation1 + $0x28] sm:$0xff pattern:$0x73625140] }
  0xe3   :  { %v2149_v35 = vld.sshfl [vmem:[#allocation1 + $0x30] sm:$0xff pattern:$0x73625140]  ;;  %v2151_v31 = vld.sshfl [vmem:[#allocation1 + $0x38] sm:$0xff pattern:$0x73625140] }
  0xe4   :  { %670 = vst [vmem:[#allocation1] ss:$4 sm:$0xff] %v493_v21  ;;  %v962_v9 = vadd.f32 %v961_v25, %v960_v6  ;;  %v977_v21 = vsel %vm334_vm1, %v2049_v59, 0.0  ;;  %v979_v25 = vsel %vm334_vm1, %v2051_v41, 0.0  ;;  %v987_v59 = vsel %vm334_vm1, %v2059_v54, 0.0 }
  0xe5   :  { %671 = vst [vmem:[#allocation1 + $0x20] ss:$4 sm:$0xff] %v494_v36  ;;  %v981_v36 = vsel %vm334_vm1, %v2053_v44, 0.0  ;;  %v989_v41 = vsel %vm334_vm1, %v2061_v39, 0.0  ;;  %v991_v44 = vsel %vm334_vm1, %v2063_v33, 0.0  ;;  %v997_v54 = vsel %vm334_vm1, %v2083_v14, 0.0 }
  0xe6   :  { %v964_v17 = vadd.f32 %v963_v23, %v962_v9  ;;  %v983_v9 = vsel %vm334_vm1, %v2055_v62, 0.0  ;;  %v993_v62 = vsel %vm334_vm1, %v2079_v0, 0.0  ;;  %v999_v39 = vsel %vm334_vm1, %v2085_v51, 0.0 }
  0xe7   :  { %v1001_v33 = vsel %vm334_vm1, %v2087_v32, 0.0  ;;  %v1003_v0 = vsel %vm334_vm1, %v2089_v16, 0.0  ;;  %v1007_v14 = vsel %vm334_vm1, %v2093_v29, 0.0  ;;  %v1009_v51 = vsel %vm334_vm1, %v2107_v2, 0.0 }
  0xe8   :  { %v966_v22 = vadd.f32 %v965_v58, %v964_v17  ;;  %v1011_v32 = vsel %vm334_vm1, %v2109_v12, 0.0  ;;  %v1013_v16 = vsel %vm334_vm1, %v2111_v53, 0.0  ;;  %v1017_v29 = vsel %vm334_vm1, %v2115_v11, 0.0 }
  0xe9   :  { %v1019_v2 = vsel %vm334_vm1, %v2117_v28, 0.0  ;;  %v1021_v12 = vsel %vm334_vm1, %v2119_v40, 0.0  ;;  %v1023_v53 = vsel %vm334_vm1, %v2121_v10, 0.0  ;;  %v1025_v52 = vsel %vm334_vm1, %v2137_v19, 0.0 }
  0xea   :  { %v968_v15 = vadd.f32 %v967_v38, %v966_v22  ;;  %v1027_v11 = vsel %vm334_vm1, %v2139_v24, 0.0  ;;  %v1029_v28 = vsel %vm334_vm1, %v2141_v27, 0.0  ;;  %v1031_v40 = vsel %vm334_vm1, %v2143_v50, 0.0 }
  0xeb   :  { %v2165_v47 = vld.sshfl [vmem:[#allocation1] sm:$0xff pattern:$0x73625140]  ;;  %v2167_v63 = vld.sshfl [vmem:[#allocation1 + $0x8] sm:$0xff pattern:$0x73625140] }
  0xec   :  { %v2169_v46 = vld.sshfl [vmem:[#allocation1 + $0x10] sm:$0xff pattern:$0x73625140]  ;;  %v970_v45 = vadd.f32 %v969_v55, %v968_v15  ;;  %v2171_v49 = vld.sshfl [vmem:[#allocation1 + $0x18] sm:$0xff pattern:$0x73625140] }
  0xed   :  { %v2173_v57 = vld.sshfl [vmem:[#allocation1 + $0x20] sm:$0xff pattern:$0x73625140]  ;;  %v2175_v60 = vld.sshfl [vmem:[#allocation1 + $0x28] sm:$0xff pattern:$0x73625140] }
  0xee   :  { %v2177_v8 = vld.sshfl [vmem:[#allocation1 + $0x30] sm:$0xff pattern:$0x73625140]  ;;  %v972_v48 = vadd.f32 %v971_v4, %v970_v45  ;;  %v2179_v7 = vld.sshfl [vmem:[#allocation1 + $0x38] sm:$0xff pattern:$0x73625140] }
  0xef   :  { %680 = vst [vmem:[#allocation1] ss:$4 sm:$0xff] %v495_v42  ;;  %v1033_v10 = vsel %vm334_vm1, %v2145_v34, 0.0  ;;  %v1035_v19 = vsel %vm334_vm1, %v2147_v1, 0.0  ;;  %v1037_v24 = vsel %vm334_vm1, %v2149_v35, 0.0  ;;  %v1039_v27 = vsel %vm334_vm1, %v2151_v31, 0.0 }
  0xf0   :  { %681 = vst [vmem:[#allocation1 + $0x20] ss:$4 sm:$0xff] %v496_v3  ;;  %v974_v26 = vadd.f32 %v973_v61, %v972_v48  ;;  %v1041_v50 = vsel %vm334_vm1, %v2165_v47, 0.0  ;;  %v1043_v34 = vsel %vm334_vm1, %v2167_v63, 0.0  ;;  %v1045_v1 = vsel %vm334_vm1, %v2169_v46, 0.0 }
  0xf1   :  { %v1047_v35 = vsel %vm334_vm1, %v2171_v49, 0.0  ;;  %v1049_v31 = vsel %vm334_vm1, %v2173_v57, 0.0  ;;  %v1051_v47 = vsel %vm334_vm1, %v2175_v60, 0.0  ;;  %v1053_v63 = vsel %vm334_vm1, %v2177_v8, 0.0 }
  0xf2   :  { %v976_v20 = vadd.f32 %v975_v43, %v974_v26  ;;  %v1055_v46 = vsel %vm334_vm1, %v2179_v7, 0.0 }
  0xf4   :  { %v978_v23 = vadd.f32 %v977_v21, %v976_v20 }
  0xf6   :  { %v980_v6 = vadd.f32 %v979_v25, %v978_v23 }
  0xf8   :  { %v982_v58 = vadd.f32 %v981_v36, %v980_v6 }
  0xfa   :  { %v984_v17 = vadd.f32 %v983_v9, %v982_v58 }
  0xfc   :  { %v986_v38 = vadd.f32 %v985_v37, %v984_v17 }
  0xfe   :  { %v988_v13 = vadd.f32 %v987_v59, %v986_v38 }
 0x100   :  { %v990_v22 = vadd.f32 %v989_v41, %v988_v13 }
 0x102   :  { %v992_v30 = vadd.f32 %v991_v44, %v990_v22 }
 0x104   :  { %v994_v55 = vadd.f32 %v993_v62, %v992_v30 }
 0x106   :  { %v996_v15 = vadd.f32 %v995_v18, %v994_v55  ;;  %v682_v55 = vld.sshfl [vmem:[#allocation1] sm:$0xff pattern:$0x73625140] }
 0x107   :  { %v1057_v49 = vsel %vm334_vm1, %v682_v55, 0.0 }
 0x108   :  { %v998_v42 = vadd.f32 %v997_v54, %v996_v15  ;;  %v683_v15 = vld.sshfl [vmem:[#allocation1 + $0x8] sm:$0xff pattern:$0x73625140] }
 0x109   :  { %v1059_v57 = vsel %vm334_vm1, %v683_v15, 0.0 }
 0x10a   :  { %v1000_v4 = vadd.f32 %v999_v39, %v998_v42  ;;  %v684_v42 = vld.sshfl [vmem:[#allocation1 + $0x10] sm:$0xff pattern:$0x73625140] }
 0x10b   :  { %v1061_v60 = vsel %vm334_vm1, %v684_v42, 0.0 }
 0x10c   :  { %v1002_v61 = vadd.f32 %v1001_v33, %v1000_v4  ;;  %v685_v4 = vld.sshfl [vmem:[#allocation1 + $0x18] sm:$0xff pattern:$0x73625140] }
 0x10d   :  { %v1063_v8 = vsel %vm334_vm1, %v685_v4, 0.0 }
 0x10e   :  { %v1004_v3 = vadd.f32 %v1003_v0, %v1002_v61  ;;  %v686_v61 = vld.sshfl [vmem:[#allocation1 + $0x20] sm:$0xff pattern:$0x73625140] }
 0x10f   :  { %v1065_v7 = vsel %vm334_vm1, %v686_v61, 0.0 }
 0x110   :  { %v1006_v45 = vadd.f32 %v1005_v5, %v1004_v3  ;;  %v687_v3 = vld.sshfl [vmem:[#allocation1 + $0x28] sm:$0xff pattern:$0x73625140] }
 0x112   :  { %v1008_v48 = vadd.f32 %v1007_v14, %v1006_v45  ;;  %v688_v45 = vld.sshfl [vmem:[#allocation1 + $0x30] sm:$0xff pattern:$0x73625140] }
 0x114   :  { %v1010_v43 = vadd.f32 %v1009_v51, %v1008_v48  ;;  %v1067_v48 = vsel %vm334_vm1, %v687_v3, 0.0 }
 0x116   :  { %v1012_v26 = vadd.f32 %v1011_v32, %v1010_v43  ;;  %v689_v32 = vld.sshfl [vmem:[#allocation1 + $0x38] sm:$0xff pattern:$0x73625140] }
 0x118   :  { %v1014_v21 = vadd.f32 %v1013_v16, %v1012_v26  ;;  %v1069_v16 = vsel %vm334_vm1, %v688_v45, 0.0 }
 0x11a   :  { %v1016_v20 = vadd.f32 %v1015_v56, %v1014_v21  ;;  %v1071_v56 = vsel %vm334_vm1, %v689_v32, 0.0 }
 0x11c   :  { %v1018_v25 = vadd.f32 %v1017_v29, %v1016_v20  ;;  %v45_v20 = vld [vmem:[%s2280_s2] sm:$0x3] }
 0x11e   :  { %v1020_v23 = vadd.f32 %v1019_v2, %v1018_v25 }
 0x120   :  { %v1022_v36 = vadd.f32 %v1021_v12, %v1020_v23 }
 0x122   :  { %v1024_v6 = vadd.f32 %v1023_v53, %v1022_v36 }
 0x124   :  { %v1026_v9 = vadd.f32 %v1025_v52, %v1024_v6 }
 0x126   :  { %v1028_v58 = vadd.f32 %v1027_v11, %v1026_v9 }
 0x128   :  { %v1030_v37 = vadd.f32 %v1029_v28, %v1028_v58 }
 0x12a   :  { %v1032_v17 = vadd.f32 %v1031_v40, %v1030_v37 }
 0x12c   :  { %v1034_v59 = vadd.f32 %v1033_v10, %v1032_v17 }
 0x12e   :  { %v1036_v38 = vadd.f32 %v1035_v19, %v1034_v59 }
 0x130   :  { %v1038_v41 = vadd.f32 %v1037_v24, %v1036_v38 }
 0x132   :  { %v1040_v13 = vadd.f32 %v1039_v27, %v1038_v41 }
 0x134   :  { %v1042_v44 = vadd.f32 %v1041_v50, %v1040_v13 }
 0x136   :  { %v1044_v22 = vadd.f32 %v1043_v34, %v1042_v44 }
 0x138   :  { %v1046_v62 = vadd.f32 %v1045_v1, %v1044_v22 }
 0x13a   :  { %v1048_v30 = vadd.f32 %v1047_v35, %v1046_v62 }
 0x13c   :  { %v1050_v18 = vadd.f32 %v1049_v31, %v1048_v30 }
 0x13e   :  { %v1052_v54 = vadd.f32 %v1051_v47, %v1050_v18 }
 0x140   :  { %v1054_v39 = vadd.f32 %v1053_v63, %v1052_v54 }
 0x142   :  { %v1056_v33 = vadd.f32 %v1055_v46, %v1054_v39 }
 0x144   :  { %v1058_v0 = vadd.f32 %v1057_v49, %v1056_v33 }
 0x146   :  { %v1060_v5 = vadd.f32 %v1059_v57, %v1058_v0 }
 0x148   :  { %v1062_v14 = vadd.f32 %v1061_v60, %v1060_v5 }
 0x14a   :  { %v1064_v51 = vadd.f32 %v1063_v8, %v1062_v14 }
 0x14c   :  { %v1066_v43 = vadd.f32 %v1065_v7, %v1064_v51 }
 0x14e   :  { %v1068_v26 = vadd.f32 %v1067_v48, %v1066_v43 }
 0x150   :  { %v1070_v21 = vadd.f32 %v1069_v16, %v1068_v26 }
 0x152   :  { %v1072_v29 = vadd.f32 %v1071_v56, %v1070_v21 }
 0x154   :  { %1073 = vadd.xlane.f32.xlu0 %v1072_v29 }
 0x1c7   :  { %v1074_v2 = vpop.xlane.xlu0 %1073 }
 0x1c8   :  { %v1075_v25 = vadd.f32 %v1074_v2, %v45_v20 }
 0x1ca   :  { %1077 = vst.msk [vmem:[%s2280_s2] sm:$0x3] %vm43_vm0, %v1075_v25 }
 0x1cb   :  { %1082 = vsyncpa [#allocation3], 1 }
 0x1cc   :  { %1083 = vsyncpa [#allocation5], 1 }

</bundles_post_ra>
